<compile_context>
chip_gen: v7x
topology: tpu7x:2x2x1
jax: 0.10.0
libtpu: 0.0.40
codegen_flags: <defaults>
</compile_context>

<pallas_src>
import jax
import jax.numpy as jnp
from jax.experimental import pallas as pl
from jax.experimental.pallas import tpu as pltpu

BN_EPS = 1e-5       # nn.BatchNorm1d default eps
NORM_EPS = 1e-12    # F.normalize default eps


def micle_kernel(pooled_ref, w_ref, vecs_ref, w2_ref, b2_ref, out_ref):
    # pooled: (B, C) bf16, w: (C, F) bf16, vecs: (3, F) f32 = [b_fold; gamma; beta]
    # w2: (F, D) bf16, b2: (1, D) f32
    vecs = vecs_ref[...]
    b_fold = vecs[0:1, :]
    gamma = vecs[1:2, :]
    beta = vecs[2:3, :]

    # ---- folded backbone-linear + projection_head[0] (Linear, bias=False) ----
    z1 = jnp.dot(pooled_ref[...], w_ref[...],
                 preferred_element_type=jnp.float32) + b_fold          # (B, F) f32

    # ---- projection_head[1]: BatchNorm1d (training mode -> batch stats,
    # biased variance, exactly as PyTorch normalizes during training) ----
    mu = jnp.mean(z1, axis=0, keepdims=True)                           # (1, F)
    var = jnp.mean((z1 - mu) ** 2, axis=0, keepdims=True)              # (1, F)
    zn = (z1 - mu) * jax.lax.rsqrt(var + BN_EPS) * gamma + beta

    # ---- projection_head[2]: ReLU ----
    r = jnp.maximum(zn, 0.0)

    # ---- projection_head[3]: Linear(feature_dim, dim, bias=True) ----
    z2 = jnp.dot(r.astype(w2_ref.dtype), w2_ref[...],
                 preferred_element_type=jnp.float32) + b2_ref[...]     # (B, D) f32

    # ---- F.normalize(z, dim=1): z / max(||z||_2, eps) via EUP rsqrt ----
    sumsq = jnp.sum(z2 * z2, axis=1, keepdims=True)                    # (B, 1)
    inv = jax.lax.rsqrt(jnp.maximum(sumsq, NORM_EPS * NORM_EPS))
    out_ref[...] = (z2 * inv).astype(out_ref.dtype)


def micle_forward(x, params):
    """x: (B, C, H, W) NCHW float32, like the PyTorch module input."""
    B = x.shape[0]
    D = params["w2"].shape[1]

    # Synthetic backbone front: global average pool over spatial dims (glue).
    pooled = jnp.mean(x, axis=(2, 3))                                  # (B, C)

    # Exact algebraic fold of the backbone linear through the bias-free
    # projection linear: (p @ wb + bb) @ w1 == p @ (wb @ w1) + (bb @ w1).
    w_fold = (params["wb"] @ params["w1"]).astype(jnp.bfloat16)        # (C, F)
    b_fold = params["bb"] @ params["w1"]                               # (1, F) f32
    vecs = jnp.concatenate([b_fold, params["gamma"], params["beta"]],
                           axis=0)                                     # (3, F) f32

    ins = (pooled.astype(jnp.bfloat16),        # bf16 activations for the MXU
           w_fold,                             # bf16 folded weight
           vecs,                               # f32 [bias; gamma; beta]
           params["w2"].astype(jnp.bfloat16),  # bf16 weight
           params["b2"])                       # f32 bias

    # Explicit VMEM budget with headroom (inputs + output, x2 for buffering).
    nbytes = sum(int(a.size) * a.dtype.itemsize for a in ins) + B * D * 4
    vmem_limit = int(min(48 * 1024 * 1024, max(4 * 1024 * 1024, 2 * nbytes)))

    # Small shapes -> single tile, whole arrays resident in VMEM, no grid.
    return pl.pallas_call(
        micle_kernel,
        out_shape=jax.ShapeDtypeStruct((B, D), jnp.float32),
        in_specs=[pl.BlockSpec(memory_space=pltpu.MemorySpace.VMEM)] * len(ins),
        out_specs=pl.BlockSpec(memory_space=pltpu.MemorySpace.VMEM),
        compiler_params=pltpu.CompilerParams(vmem_limit_bytes=vmem_limit),
    )(*ins)


def init_params(key, in_channels, feature_dim, dim):
    """Deterministic synthetic parameters (shapes follow MICLe.__init__)."""
    k = jax.random.split(key, 5)
    scale = 0.1
    return {
        # synthetic backbone linear: (C -> feature_dim), stored as (in, out)
        "wb": scale * jax.random.normal(k[0], (in_channels, feature_dim), jnp.float32),
        "bb": scale * jax.random.normal(k[1], (1, feature_dim), jnp.float32),
        # projection_head[0]: Linear(feature_dim, feature_dim, bias=False), (in, out)
        "w1": scale * jax.random.normal(k[2], (feature_dim, feature_dim), jnp.float32),
        # projection_head[1]: BatchNorm1d(feature_dim) (PyTorch init: gamma=1, beta=0)
        "gamma": jnp.ones((1, feature_dim), jnp.float32),
        "beta": jnp.zeros((1, feature_dim), jnp.float32),
        # projection_head[3]: Linear(feature_dim, dim, bias=True), (in, out)
        "w2": scale * jax.random.normal(k[3], (feature_dim, dim), jnp.float32),
        "b2": scale * jax.random.normal(k[4], (1, dim), jnp.float32),
    }


def micle_reference(x, params):
    """Pure-JAX reference mirroring the kernel's bf16-weight numerics."""
    pooled = jnp.mean(x, axis=(2, 3))
    w_fold = (params["wb"] @ params["w1"]).astype(jnp.bfloat16)
    b_fold = params["bb"] @ params["w1"]
    z1 = jnp.dot(pooled.astype(jnp.bfloat16), w_fold,
                 preferred_element_type=jnp.float32) + b_fold
    mu = jnp.mean(z1, axis=0, keepdims=True)
    var = jnp.mean((z1 - mu) ** 2, axis=0, keepdims=True)
    zn = (z1 - mu) / jnp.sqrt(var + BN_EPS) * params["gamma"] + params["beta"]
    r = jnp.maximum(zn, 0.0)
    z2 = jnp.dot(r.astype(jnp.bfloat16), params["w2"].astype(jnp.bfloat16),
                 preferred_element_type=jnp.float32) + params["b2"]
    norm = jnp.sqrt(jnp.sum(z2 * z2, axis=1, keepdims=True))
    return z2 / jnp.maximum(norm, NORM_EPS)


if __name__ == "__main__":
    B, C, H, W = 2, 4, 16, 16
    FEATURE_DIM = 128   # backbone.output_dim (synthetic, lane-dense)
    DIM = 128           # MICLe default projection dim (lane-dense output)

    key = jax.random.PRNGKey(0)
    kx, kp = jax.random.split(key)
    x = jax.random.normal(kx, (B, C, H, W), jnp.float32)
    params = init_params(kp, C, FEATURE_DIM, DIM)

    out = micle_forward(x, params)
    out = jax.block_until_ready(out)

    ref = micle_reference(x, params)
    assert out.shape == (B, DIM)
    assert bool(jnp.allclose(out, ref, atol=1e-4, rtol=1e-4)), "mismatch vs reference"
    # rows should be unit-norm
    assert bool(jnp.allclose(jnp.linalg.norm(out, axis=1), 1.0, atol=1e-5))

    print("KERNEL_OK")
</pallas_src>

<mosaic_0001>
module attributes {stable_mosaic.version = 11 : i64} {
  func.func @micle_kernel(%arg0: memref<2x4xbf16, #tpu.memory_space<vmem>>, %arg1: memref<4x128xbf16, #tpu.memory_space<vmem>>, %arg2: memref<3x128xf32, #tpu.memory_space<vmem>>, %arg3: memref<128x128xbf16, #tpu.memory_space<vmem>>, %arg4: memref<1x128xf32, #tpu.memory_space<vmem>>, %arg5: memref<2x128xf32, #tpu.memory_space<vmem>>) attributes {dimension_semantics = [], scalar_prefetch = 0 : i64, scratch_operands = 0 : i64, tpu.core_type = #tpu.core_type<tc>} {
    %c0 = arith.constant 0 : index
    %c0_0 = arith.constant 0 : index
    %0 = vector.load %arg2[%c0, %c0_0] : memref<3x128xf32, #tpu.memory_space<vmem>>, vector<3x128xf32>
    %1 = vector.extract_strided_slice %0 {offsets = [0, 0], sizes = [1, 128], strides = [1, 1]} : vector<3x128xf32> to vector<1x128xf32>
    %2 = vector.extract_strided_slice %0 {offsets = [1, 0], sizes = [1, 128], strides = [1, 1]} : vector<3x128xf32> to vector<1x128xf32>
    %3 = vector.extract_strided_slice %0 {offsets = [2, 0], sizes = [1, 128], strides = [1, 1]} : vector<3x128xf32> to vector<1x128xf32>
    %c0_1 = arith.constant 0 : index
    %c0_2 = arith.constant 0 : index
    %4 = vector.load %arg0[%c0_1, %c0_2] : memref<2x4xbf16, #tpu.memory_space<vmem>>, vector<2x4xbf16>
    %c0_3 = arith.constant 0 : index
    %c0_4 = arith.constant 0 : index
    %5 = vector.load %arg1[%c0_3, %c0_4] : memref<4x128xbf16, #tpu.memory_space<vmem>>, vector<4x128xbf16>
    %cst = arith.constant dense<0.000000e+00> : vector<2x128xf32>
    %6 = tpu.matmul %4, %5, %cst {dimension_numbers = #tpu.dot_dimension_numbers<[1], [0], [0], [1], [0, 0, 1, 1], [], []>} : vector<2x4xbf16>, vector<4x128xbf16>, vector<2x128xf32> -> vector<2x128xf32>
    %7 = vector.broadcast %1 : vector<1x128xf32> to vector<2x128xf32>
    %8 = arith.addf %6, %7 : vector<2x128xf32>
    %cst_5 = arith.constant dense<0.000000e+00> : vector<128xf32>
    %9 = vector.multi_reduction <add>, %8, %cst_5 [0] : vector<2x128xf32> to vector<128xf32>
    %10 = vector.shape_cast %9 : vector<128xf32> to vector<1x128xf32>
    %cst_6 = arith.constant 2.000000e+00 : f32
    %11 = vector.broadcast %cst_6 : f32 to vector<1x128xf32>
    %12 = arith.divf %10, %11 : vector<1x128xf32>
    %13 = vector.broadcast %12 : vector<1x128xf32> to vector<2x128xf32>
    %14 = arith.subf %8, %13 : vector<2x128xf32>
    %15 = arith.mulf %14, %14 : vector<2x128xf32>
    %cst_7 = arith.constant dense<0.000000e+00> : vector<128xf32>
    %16 = vector.multi_reduction <add>, %15, %cst_7 [0] : vector<2x128xf32> to vector<128xf32>
    %17 = vector.shape_cast %16 : vector<128xf32> to vector<1x128xf32>
    %cst_8 = arith.constant 2.000000e+00 : f32
    %18 = vector.broadcast %cst_8 : f32 to vector<1x128xf32>
    %19 = arith.divf %17, %18 : vector<1x128xf32>
    %20 = vector.broadcast %12 : vector<1x128xf32> to vector<2x128xf32>
    %21 = arith.subf %8, %20 : vector<2x128xf32>
    %cst_9 = arith.constant 9.99999974E-6 : f32
    %22 = vector.broadcast %cst_9 : f32 to vector<1x128xf32>
    %23 = arith.addf %19, %22 : vector<1x128xf32>
    %24 = math.rsqrt %23 : vector<1x128xf32>
    %25 = vector.broadcast %24 : vector<1x128xf32> to vector<2x128xf32>
    %26 = arith.mulf %21, %25 : vector<2x128xf32>
    %27 = vector.broadcast %2 : vector<1x128xf32> to vector<2x128xf32>
    %28 = arith.mulf %26, %27 : vector<2x128xf32>
    %29 = vector.broadcast %3 : vector<1x128xf32> to vector<2x128xf32>
    %30 = arith.addf %28, %29 : vector<2x128xf32>
    %cst_10 = arith.constant 0.000000e+00 : f32
    %31 = vector.broadcast %cst_10 : f32 to vector<2x128xf32>
    %32 = arith.maximumf %30, %31 : vector<2x128xf32>
    %33 = arith.truncf %32 : vector<2x128xf32> to vector<2x128xbf16>
    %c0_11 = arith.constant 0 : index
    %c0_12 = arith.constant 0 : index
    %34 = vector.load %arg3[%c0_11, %c0_12] : memref<128x128xbf16, #tpu.memory_space<vmem>>, vector<128x128xbf16>
    %cst_13 = arith.constant dense<0.000000e+00> : vector<2x128xf32>
    %35 = tpu.matmul %33, %34, %cst_13 {dimension_numbers = #tpu.dot_dimension_numbers<[1], [0], [0], [1], [0, 0, 1, 1], [], []>} : vector<2x128xbf16>, vector<128x128xbf16>, vector<2x128xf32> -> vector<2x128xf32>
    %c0_14 = arith.constant 0 : index
    %c0_15 = arith.constant 0 : index
    %36 = vector.load %arg4[%c0_14, %c0_15] : memref<1x128xf32, #tpu.memory_space<vmem>>, vector<1x128xf32>
    %37 = vector.broadcast %36 : vector<1x128xf32> to vector<2x128xf32>
    %38 = arith.addf %35, %37 : vector<2x128xf32>
    %39 = arith.mulf %38, %38 : vector<2x128xf32>
    %cst_16 = arith.constant dense<0.000000e+00> : vector<2xf32>
    %40 = vector.multi_reduction <add>, %39, %cst_16 [1] : vector<2x128xf32> to vector<2xf32>
    %41 = vector.shape_cast %40 : vector<2xf32> to vector<2x1xf32>
    %cst_17 = arith.constant 1.000000e-24 : f32
    %42 = vector.broadcast %cst_17 : f32 to vector<2x1xf32>
    %43 = arith.maximumf %41, %42 : vector<2x1xf32>
    %44 = math.rsqrt %43 : vector<2x1xf32>
    %45 = vector.broadcast %44 : vector<2x1xf32> to vector<2x128xf32>
    %46 = arith.mulf %38, %45 : vector<2x128xf32>
    %c0_18 = arith.constant 0 : index
    %c0_19 = arith.constant 0 : index
    %47 = vector.load %arg5[%c0_18, %c0_19] : memref<2x128xf32, #tpu.memory_space<vmem>>, vector<2x128xf32>
    tpu.vector_store %arg5[%c0_18, %c0_19], %46 {strides = array<i32>} : memref<2x128xf32, #tpu.memory_space<vmem>>, vector<2x128xf32>,
    return
  }
}

</mosaic_0001>

<bundles_post_ra>
// kernel: tpu_custom_call.1
= control target key start
LH: loop header
LB: loop body
LE: loop exit
PB: predicated region body
PF: predicated region fallthrough
CT: control target
= control target key end

     0   :  { %10 = vsyncpa [#allocation3], 0  ;;  %s503_s0 = inlined_call_operand.hbm [shape: bf16[2,4], index: 0, kind: input, shape index: {}]   ;;  %s504_s1 = inlined_call_operand.vmem [shape: bf16[4,128], index: 1, kind: input, shape index: {}]   ;;  %s505_s2 = inlined_call_operand.vmem [shape: f32[3,128], index: 2, kind: input, shape index: {}]   ;;  %s506_s3 = inlined_call_operand.hbm [shape: bf16[128,128], index: 3, kind: input, shape index: {}]   ;;  %s507_s4 = inlined_call_operand.vmem [shape: f32[1,128], index: 4, kind: input, shape index: {}]   ;;  %s508_s5 = inlined_call_operand.hbm [shape: f32[2,128], index: 5, kind: output, shape index: {}]  }
   0x1   :  { %11 = vsyncpa [#allocation6], 0 }
   0x2   :  { %12 = vsyncpa [#allocation4], 0  ;;  %s410_s18 = smov [#allocation2]   ;;  %s411_s20 = smov [#allocation5]  }
   0x3   :  { %s19_s19 = sshll.u32 %s410_s18, 4  ;;  %s32_s21 = sshll.u32 %s411_s20, 4  ;;  %s20_s19 = int_to_ptr.vmem [resolvable:$true] %s19_s19  ;;  %s447_s21 = int_to_ptr.vmem [resolvable:$true] %s32_s21 }
   0x4   :  { %s338_s24 = scalar_lea.hbm %s503_s0, 16 }
   0x5   :  { %p339_p0 = scmp.ne.s32.totalorder %s503_s0, %s338_s24  ;;  %p342_p1 = scmp.lt.u32.totalorder %s338_s24, %s503_s0 }
   0x7   :  { %p344_p2 = pnand %p342_p1, %p339_p0 }
   0x9   :  { %347 = shalt.err (!%p344_p2)
}
   0xa   :  { %s348_s29 = scalar_lea.vmem %s20_s19, 16  ;;  %s352_s30 = scalar_lea.vmem %s20_s19, 32 }
   0xb   :  { %p349_p3 = scmp.ne.s32.totalorder %s20_s19, %s348_s29  ;;  %p353_p4 = scmp.lt.s32.totalorder %s20_s19, %s20_s19 }
   0xc   :  { %p354_p5 = scmp.lt.s32.totalorder %s352_s30, %s348_s29 }
   0xe   :  { %p355_p6 = por %p354_p5, %p353_p4 }
  0x10   :  { %p356_p7 = pnand %p355_p6, %p349_p3 }
  0x12   :  { %359 = shalt.err (!%p356_p7)
}
  0x13   :  { %22 = dma.hbm_to_vmem [thread:$0]  %s503_s0, 16, %s20_s19, [#allocation3]  }
  0x14   :  { %s360_s10 = scalar_lea.hbm %s506_s3, 1024 }
  0x15   :  { %p361_p8 = scmp.ne.s32.totalorder %s506_s3, %s360_s10  ;;  %p364_p9 = scmp.lt.u32.totalorder %s360_s10, %s506_s3 }
  0x17   :  { %p366_p10 = pnand %p364_p9, %p361_p8 }
  0x19   :  { %369 = shalt.err (!%p366_p10)
}
  0x1a   :  { %s370_s15 = scalar_lea.vmem %s447_s21, 1024  ;;  %p375_p12 = scmp.lt.s32.totalorder %s447_s21, %s447_s21 }
  0x1b   :  { %p371_p11 = scmp.ne.s32.totalorder %s447_s21, %s370_s15  ;;  %p376_p13 = scmp.lt.s32.totalorder %s370_s15, %s370_s15 }
  0x1d   :  { %p377_p0 = por %p376_p13, %p375_p12 }
  0x1f   :  { %p378_p1 = pnand %p377_p0, %p371_p11 }
  0x21   :  { %381 = shalt.err (!%p378_p1)
}
  0x22   :  { %s412_s0 = smov 64   ;;  %s413_s16 = smov 4  }
  0x23   :  { %38 = dma.hbm_to_vmem [thread:$0]  %s506_s3, 1024, %s447_s21, [#allocation6], %s412_s0, %s412_s0, %s413_s16  }
  0x24   :  { %404 = dma.done.wait [#allocation3], 16  }
  0x25   :  { %405 = vsyncadd [#allocation3], 4294967280 }
  0x26   :  { %406 = dma.done.wait [#allocation6], 1024  }
  0x27   :  { %407 = vsyncadd [#allocation6], 4294966272  ;;  %v414_v0 = vmov 0.0   ;;  %vm415_vm0 = vmmov 0   ;;  %vm59_vm1 = vcmask 1041408   ;;  %vm55_vm2 = vcmask 31744  }
  0x28   :  { %293 = vmatprep.subr.bf16.mxu0 %v414_v0  ;;  %295 = vmatprep.mubr.msk.bf16.mxu0 %vm415_vm0, %v414_v0  ;;  %v50_v1 = vld [vmem:[%s504_s1] sm:$0x3]  ;;  %v49_v2 = vld [vmem:[#allocation2] sm:$0x1]  ;;  %v326_v4 = vld [vmem:[#allocation5] sm:$0xff]   ;;  %v51_v12 = vlaneseq  ;;  %s416_s22 = smov [#allocation7]  }
  0x29   :  { %299 = vmatprep.subr.bf16.mxu1 %v414_v0  ;;  %315 = vmatprep.mubr.msk.bf16.mxu1 %vm415_vm0, %v414_v0  ;;  %v61_v3 = vsel %vm59_vm1, %v50_v1, 0  ;;  %v327_v5 = vld [vmem:[#allocation5 + $0x8] sm:$0xff]   ;;  %v328_v6 = vld [vmem:[#allocation5 + $0x10] sm:$0xff]   ;;  %v329_v7 = vld [vmem:[#allocation5 + $0x18] sm:$0xff]   ;;  %s262_s23 = sshll.u32 %s416_s22, 4  ;;  %s263_s23 = int_to_ptr.vmem [resolvable:$true] %s262_s23 }
  0x2a   :  { %294 = vmatpush3.bf16.msra.mxu0 %v61_v3  ;;  %300 = vmatpush3.bf16.msra.mxu1 %v326_v4  ;;  %v330_v8 = vld [vmem:[#allocation5 + $0x20] sm:$0xff]   ;;  %v331_v9 = vld [vmem:[#allocation5 + $0x28] sm:$0xff]   ;;  %v332_v10 = vld [vmem:[#allocation5 + $0x30] sm:$0xff]   ;;  %v52_v13 = vshrl.u32 %v51_v12, 7  ;;  %s382_s24 = scalar_lea.vmem %s263_s23, 32  ;;  %p387_p3 = scmp.lt.s32.totalorder %s263_s23, %s263_s23 }
  0x2b   :  { %301 = vmatprep.subr.bf16.mxu1 %v414_v0  ;;  %v333_v11 = vld [vmem:[#allocation5 + $0x38] sm:$0xff]   ;;  %v48_v15 = vld [vmem:[%s505_s2] sm:$0x7]  ;;  %p383_p2 = scmp.ne.s32.totalorder %s263_s23, %s382_s24  ;;  %p388_p4 = scmp.lt.s32.totalorder %s382_s24, %s382_s24 }
  0x2c   :  { %v53_v14 = vsub.s32 0, %v52_v13  ;;  %v127_v41 = vsub.s32 1, %v52_v13  ;;  %v132_v42 = vsub.s32 2, %v52_v13  ;;  %v273_v51 = vld [vmem:[%s507_s4] ss:$0 sm:$0xff] }
  0x2d   :  { %296 = vmatmul.mubr.msk.bf16.vlgmr.msra.gmra.mrb[0].mxu0 %vm55_vm2, %v49_v2  ;;  %p389_p5 = por %p388_p4, %p387_p3 }
  0x2e   :  { %302 = vmatpush3.bf16.msra.mxu1 %v327_v5  ;;  %v54_v16 = vrot.slane %v48_v15, %v53_v14  ;;  %v128_v43 = vrot.slane %v48_v15, %v127_v41  ;;  %v133_v46 = vrot.slane %v48_v15, %v132_v42 }
  0x2f   :  { %303 = vmatprep.subr.bf16.mxu1 %v414_v0  ;;  %p390_p6 = pnand %p389_p5, %p383_p2 }
  0x32   :  { %304 = vmatpush3.bf16.msra.mxu1 %v328_v6 }
  0x33   :  { %305 = vmatprep.subr.bf16.mxu1 %v414_v0 }
  0x36   :  { %306 = vmatpush3.bf16.msra.mxu1 %v329_v7 }
  0x37   :  { %307 = vmatprep.subr.bf16.mxu1 %v414_v0 }
  0x3a   :  { %308 = vmatpush3.bf16.msra.mxu1 %v330_v8 }
  0x3b   :  { %309 = vmatprep.subr.bf16.mxu1 %v414_v0 }
  0x3e   :  { %310 = vmatpush3.bf16.msra.mxu1 %v331_v9 }
  0x3f   :  { %311 = vmatprep.subr.bf16.mxu1 %v414_v0 }
  0x42   :  { %312 = vmatpush3.bf16.msra.mxu1 %v332_v10 }
  0x43   :  { %313 = vmatprep.subr.bf16.mxu1 %v414_v0 }
  0x46   :  { %314 = vmatpush3.bf16.msra.mxu1 %v333_v11 }
 0x100   :  { %v97_v17 = vpop.f32.mrb[0].mxu0 }
 0x101   :  { %v98_v18 = vadd.f32 %v97_v17, %v54_v16  ;;  %v297_v19 = vpop.f32.mrb[1].mxu0 }
 0x102   :  { %v100_v20 = vpop.f32.mrb[2].mxu0 }
 0x103   :  { %v103_v21 = vsel %vm59_vm1, %v98_v18, 0.0  ;;  %v298_v22 = vpop.f32.mrb[3].mxu0 }
 0x104   :  { %v104_v23 = vrot.slane %v103_v21, 4 }
 0x106   :  { %v105_v24 = vadd.f32 %v104_v23, %v103_v21 }
 0x108   :  { %v106_v25 = vrot.slane %v105_v24, 2 }
 0x10a   :  { %v107_v26 = vadd.f32 %v106_v25, %v105_v24 }
 0x10c   :  { %v108_v27 = vrot.slane %v107_v26, 1 }
 0x10e   :  { %v109_v28 = vadd.f32 %v108_v27, %v107_v26 }
 0x110   :  { %v111_v29 = vmul.f32 0.5, %v109_v28 }
 0x112   :  { %v112_v30 = vsub.f32 %v98_v18, %v111_v29 }
 0x114   :  { %v113_v31 = vmul.f32 %v112_v30, %v112_v30 }
 0x116   :  { %v114_v32 = vsel %vm59_vm1, %v113_v31, 0.0 }
 0x117   :  { %v115_v33 = vrot.slane %v114_v32, 4 }
 0x119   :  { %v116_v34 = vadd.f32 %v115_v33, %v114_v32 }
 0x11b   :  { %v117_v35 = vrot.slane %v116_v34, 2 }
 0x11d   :  { %v118_v36 = vadd.f32 %v117_v35, %v116_v34 }
 0x11f   :  { %v119_v37 = vrot.slane %v118_v36, 1 }
 0x121   :  { %v120_v38 = vadd.f32 %v119_v37, %v118_v36 }
 0x123   :  { %v121_v39 = vmul.f32 0.5, %v120_v38 }
 0x125   :  { %v122_v40 = vadd.f32 1e-05, %v121_v39 }
 0x127   :  { %334 = vrsqrt.f32 %v122_v40 }
 0x131   :  { %v335_v44 = vpop.eup %334 }
 0x132   :  { %v124_v45 = vmul.f32 %v335_v44, %v112_v30 }
 0x134   :  { %v129_v47 = vmul.f32 %v128_v43, %v124_v45 }
 0x136   :  { %v134_v48 = vadd.f32 %v133_v46, %v129_v47 }
 0x138   :  { %v135_v49 = vmax.f32 %v134_v48, 0.0 }
 0x13a   :  { %v136_v50 = vpack.c.bf16 %v135_v49, %v135_v49 }
 0x13c   :  { %316 = vmatmul.mubr.bf16.vlgmr.msra.gmra.mrb[0].mxu1 %v136_v50 }
 0x20f   :  { %v242_v52 = vpop.f32.mrb[0].mxu1 }
 0x210   :  { %v243_v53 = vadd.f32 %v273_v51, %v242_v52  ;;  %v317_v54 = vpop.f32.mrb[1].mxu1 }
 0x211   :  { %v245_v55 = vpop.f32.mrb[2].mxu1 }
 0x212   :  { %v318_v56 = vpop.f32.mrb[3].mxu1  ;;  %v248_v57 = vmul.f32 %v243_v53, %v243_v53 }
 0x214   :  { %v249_v58 = vsel %vm59_vm1, %v248_v57, 0.0 }
 0x215   :  { %250 = vadd.xlane.f32.xlu0 %v249_v58 }
 0x2a2   :  { %v251_v59 = vpop.xlane.xlu0 %250 }
 0x2a3   :  { %v252_v60 = vmax.f32 %v251_v59, 1e-24 }
 0x2a5   :  { %336 = vrsqrt.f32 %v252_v60 }
 0x2af   :  { %v337_v61 = vpop.eup %336 }
 0x2b0   :  { %v254_v62 = vmul.f32 %v337_v61, %v243_v53 }
 0x2b2   :  { %255 = vst [vmem:[#allocation7] sm:$0x3] %v254_v62 }
 0x2b3   :  { %393 = shalt.err (!%p390_p6)
}
 0x2b4   :  { %s394_s26 = scalar_lea.hbm %s508_s5, 32 }
 0x2b5   :  { %p395_p7 = scmp.ne.s32.totalorder %s508_s5, %s394_s26  ;;  %p398_p8 = scmp.lt.u32.totalorder %s394_s26, %s508_s5 }
 0x2b7   :  { %p400_p9 = pnand %p398_p8, %p395_p7 }
 0x2b9   :  { %403 = shalt.err (!%p400_p9)
}
 0x2ba   :  { %265 = dma.vmem_to_hbm [thread:$0]  %s263_s23, 32, %s508_s5, [#allocation4]  }
 0x2bb   :  { %408 = dma.done.wait [#allocation4], 32  }
 0x2bc   :  { %409 = vsyncadd [#allocation4], 4294967264 }
 0x2bd   :  { %269 = vsyncpa [#allocation3], 1 }
 0x2be   :  { %270 = vsyncpa [#allocation6], 1 }
 0x2bf   :  { %271 = vsyncpa [#allocation4], 1 }

</bundles_post_ra>
